<compile_context>
chip_gen: v5e
topology: v5e:2x2
jax: 0.10.0
libtpu: 0.0.40
codegen_flags: <defaults>
</compile_context>

<pallas_src>
import functools
from typing import NamedTuple

import jax
import jax.numpy as jnp
from jax.experimental import pallas as pl
from jax.experimental.pallas import tpu as pltpu


def _round_up(a: int, b: int) -> int:
    return (a + b - 1) // b * b


def _tpu_vmem_capacity() -> int:
    try:
        cap = int(pltpu.get_tpu_info().vmem_capacity_bytes)
        if cap > 0:
            return cap
    except Exception:
        pass
    return 64 * 1024 * 1024  # conservative fallback (v7x per-core VMEM)


# ----------------------------- kernels -----------------------------

def _layer_norm(x_f32, gamma, beta, *, eps, d_orig, d_pad):
    inv_d = 1.0 / float(d_orig)
    if d_orig != d_pad:
        lane = jax.lax.broadcasted_iota(jnp.int32, (1, d_pad), 1)
        mask = (lane < d_orig).astype(jnp.float32)
        x_f32 = x_f32 * mask
        mean = jnp.sum(x_f32, axis=-1, keepdims=True) * inv_d
        centered = (x_f32 - mean) * mask
    else:
        mean = jnp.sum(x_f32, axis=-1, keepdims=True) * inv_d
        centered = x_f32 - mean
    var = jnp.sum(centered * centered, axis=-1, keepdims=True) * inv_d
    xn = centered * jax.lax.rsqrt(var + eps)
    return xn * gamma + beta


def _ffn_kernel_resident(x_ref, gamma_ref, beta_ref, w1_ref, b1_ref,
                         w2_ref, b2_ref, o_ref, *, eps, d_orig, d_pad):
    # Weights are VMEM-resident (constant index_map); single hidden pass per row tile.
    xn = _layer_norm(x_ref[...].astype(jnp.float32), gamma_ref[...], beta_ref[...],
                     eps=eps, d_orig=d_orig, d_pad=d_pad)
    h = jnp.dot(xn.astype(jnp.bfloat16), w1_ref[...],
                preferred_element_type=jnp.float32) + b1_ref[...]
    h = h * jax.nn.sigmoid(h)                      # Swish; dropout_1 (p=0) -> identity
    out = jnp.dot(h.astype(jnp.bfloat16), w2_ref[...],
                  preferred_element_type=jnp.float32) + b2_ref[...]
    o_ref[...] = out.astype(o_ref.dtype)           # dropout_2 (p=0) -> identity


def _ffn_kernel_tiled(x_ref, gamma_ref, beta_ref, w1_ref, b1_ref,
                      w2_ref, b2_ref, o_ref, xn_ref, *scratch,
                      eps, d_orig, d_pad, acc_in_out):
    # Grid: (row_tile, hidden_tile); hidden is innermost / "arbitrary".
    h_idx = pl.program_id(1)
    n_h = pl.num_programs(1)
    acc_ref = None if acc_in_out else scratch[0]

    @pl.when(h_idx == 0)
    def _init():
        xn = _layer_norm(x_ref[...].astype(jnp.float32), gamma_ref[...],
                         beta_ref[...], eps=eps, d_orig=d_orig, d_pad=d_pad)
        xn_ref[...] = xn.astype(xn_ref.dtype)      # cached bf16 LN rows for all h steps
        if not acc_in_out:
            acc_ref[...] = jnp.zeros_like(acc_ref)

    hblk = jnp.dot(xn_ref[...], w1_ref[...],
                   preferred_element_type=jnp.float32) + b1_ref[...]
    hblk = hblk * jax.nn.sigmoid(hblk)             # Swish; dropout_1 (p=0) -> identity
    partial = jnp.dot(hblk.astype(w2_ref.dtype), w2_ref[...],
                      preferred_element_type=jnp.float32)

    if acc_in_out:
        # o_ref is f32 and resident across the hidden axis: accumulate in place.
        @pl.when(h_idx == 0)
        def _first():
            o_ref[...] = partial + b2_ref[...]

        @pl.when(h_idx > 0)
        def _rest():
            o_ref[...] += partial
    else:
        acc_ref[...] += partial

        @pl.when(h_idx == n_h - 1)
        def _fin():
            o_ref[...] = (acc_ref[...] + b2_ref[...]).astype(o_ref.dtype)


# ------------------------- config selection -------------------------

class _FFNConfig(NamedTuple):
    tm: int
    th: int
    resident: bool
    acc_in_out: bool
    vmem_limit_bytes: int


def _choose_config(N, d_pad, h_pad, out_bytes, *, tm=None, th=None,
                   force_tiled=False, vmem_limit_bytes=None):
    vmem_cap = _tpu_vmem_capacity()
    if vmem_limit_bytes is None:
        # Never request the full physical VMEM (v7x only has 64 MiB); raise toward
        # ~112 MiB on 128 MiB parts so big tiles become possible.
        vmem_limit_bytes = min(112 * 1024 * 1024, (vmem_cap * 7) // 8)
    budget = max(vmem_limit_bytes - 4 * 1024 * 1024, vmem_limit_bytes // 2)

    small = 2 * (h_pad + 3 * d_pad) * 4 * 8        # padded 1-row biases, double-buffered

    n_rows = _round_up(max(N, 1), 8)
    if tm is None:
        tm_target = 768 if vmem_cap >= 96 * 1024 * 1024 else 512
        if n_rows >= 256:
            # keep >= 2 row tiles so the "parallel" axis can feed both cores (v7x megacore)
            tm_target = min(tm_target, _round_up((n_rows + 1) // 2, 8))
    else:
        tm_target = tm
    tm_target = max(8, min(_round_up(tm_target, 8), n_rows))

    tm_cands = [t for t in (1024, 768, 512, 384, 256, 128, 64, 32, 16, 8)
                if t <= tm_target]
    if tm_target not in tm_cands:
        tm_cands.insert(0, tm_target)

    acc_in_out = out_bytes == 4

    def resident_bytes(tm_):
        w = 2 * (2 * d_pad * h_pad * 2)                       # bf16 W1+W2, double-buffered
        rows = 2 * tm_ * d_pad * (4 + out_bytes)              # x + out blocks
        tmp = tm_ * (d_pad * 6 + h_pad * 6)                   # xn/out temps + hidden temps
        return w + rows + tmp + small

    def tiled_bytes(tm_, th_):
        w = 2 * (2 * d_pad * th_ * 2)                         # W1/W2 hidden tiles
        rows = 2 * tm_ * d_pad * (4 + out_bytes) + tm_ * d_pad * 2
        if not acc_in_out:
            rows += tm_ * d_pad * 4                           # f32 acc scratch
        tmp = tm_ * (th_ * 6 + d_pad * 4)
        return w + rows + tmp + small

    if not force_tiled:
        for tm_ in tm_cands:
            if resident_bytes(tm_) <= budget:
                return _FFNConfig(tm=tm_, th=h_pad, resident=True,
                                  acc_in_out=True, vmem_limit_bytes=vmem_limit_bytes)

    if th is not None:
        th_ = min(_round_up(th, 128), h_pad)
        th_cands = [th_ if h_pad % th_ == 0 else 128]
    else:
        th_cands = [t for t in (2048, 1024, 512, 256, 128)
                    if t <= h_pad and h_pad % t == 0]
        if not th_cands:
            th_cands = [h_pad]

    for tm_ in tm_cands:
        for th_ in th_cands:
            if tiled_bytes(tm_, th_) <= budget:
                return _FFNConfig(tm=tm_, th=th_, resident=False,
                                  acc_in_out=acc_in_out,
                                  vmem_limit_bytes=vmem_limit_bytes)
    # Nothing fits our (conservative) estimate: fall back to the smallest tiles.
    return _FFNConfig(tm=tm_cands[-1], th=th_cands[-1], resident=False,
                      acc_in_out=acc_in_out, vmem_limit_bytes=vmem_limit_bytes)


# ----------------------------- wrapper -----------------------------

def make_feed_forward(gamma, beta, w1, b1, w2, b2, *, eps=1e-5, out_dtype=None,
                      tm=None, th=None, force_tiled=False, vmem_limit_bytes=None):
    """Prepack (pad + bf16-cast) parameters once and return a forward callable.

    w1: (dim, 4*dim), w2: (4*dim, dim) -- i.e. transposed PyTorch Linear weights so the
    kernel computes x @ W directly.  forward(x) accepts (..., dim) and returns (..., dim).
    """
    dim, hidden = int(w1.shape[0]), int(w1.shape[1])
    d_pad = _round_up(dim, 128)
    h_pad = _round_up(hidden, 128)

    def pad2(a, rows, cols, dtype):
        a = jnp.asarray(a, dtype)
        return jnp.pad(a, ((0, rows - a.shape[0]), (0, cols - a.shape[1])))

    # Hoisted out of the per-call path (done once here).
    gamma_p = pad2(gamma.reshape(1, dim), 1, d_pad, jnp.float32)
    beta_p = pad2(beta.reshape(1, dim), 1, d_pad, jnp.float32)
    w1_p = pad2(w1, d_pad, h_pad, jnp.bfloat16)
    b1_p = pad2(b1.reshape(1, hidden), 1, h_pad, jnp.float32)
    w2_p = pad2(w2, h_pad, d_pad, jnp.bfloat16)
    b2_p = pad2(b2.reshape(1, dim), 1, d_pad, jnp.float32)

    def forward(x):
        orig_shape = x.shape
        assert orig_shape[-1] == dim, f"expected trailing dim {dim}, got {orig_shape}"
        N = 1
        for s in orig_shape[:-1]:
            N *= int(s)

        o_dtype = jnp.dtype(out_dtype) if out_dtype is not None else jnp.dtype(x.dtype)
        cfg = _choose_config(N, d_pad, h_pad, o_dtype.itemsize, tm=tm, th=th,
                             force_tiled=force_tiled,
                             vmem_limit_bytes=vmem_limit_bytes)

        n_pad = _round_up(N, cfg.tm)
        n_row_tiles = n_pad // cfg.tm
        x_p = jnp.pad(x.reshape(N, dim), ((0, n_pad - N), (0, d_pad - dim)))

        if cfg.resident:
            kernel = functools.partial(_ffn_kernel_resident, eps=eps,
                                       d_orig=dim, d_pad=d_pad)
            grid = (n_row_tiles,)
            in_specs = [
                pl.BlockSpec((cfg.tm, d_pad), lambda i: (i, 0)),   # x rows
                pl.BlockSpec((1, d_pad), lambda i: (0, 0)),        # gamma
                pl.BlockSpec((1, d_pad), lambda i: (0, 0)),        # beta
                pl.BlockSpec((d_pad, h_pad), lambda i: (0, 0)),    # W1 (VMEM-resident)
                pl.BlockSpec((1, h_pad), lambda i: (0, 0)),        # b1
                pl.BlockSpec((h_pad, d_pad), lambda i: (0, 0)),    # W2 (VMEM-resident)
                pl.BlockSpec((1, d_pad), lambda i: (0, 0)),        # b2
            ]
            out_spec = pl.BlockSpec((cfg.tm, d_pad), lambda i: (i, 0))
            scratch = []
            dims_sem = ("parallel",)
            weight_bytes = (w1_p.size + w2_p.size) * 2             # streamed once total
        else:
            kernel = functools.partial(_ffn_kernel_tiled, eps=eps, d_orig=dim,
                                       d_pad=d_pad, acc_in_out=cfg.acc_in_out)
            grid = (n_row_tiles, h_pad // cfg.th)
            in_specs = [
                pl.BlockSpec((cfg.tm, d_pad), lambda i, h: (i, 0)),
                pl.BlockSpec((1, d_pad), lambda i, h: (0, 0)),
                pl.BlockSpec((1, d_pad), lambda i, h: (0, 0)),
                pl.BlockSpec((d_pad, cfg.th), lambda i, h: (0, h)),  # W1 hidden tile
                pl.BlockSpec((1, cfg.th), lambda i, h: (0, h)),      # b1 hidden tile
                pl.BlockSpec((cfg.th, d_pad), lambda i, h: (h, 0)),  # W2 hidden tile
                pl.BlockSpec((1, d_pad), lambda i, h: (0, 0)),
            ]
            out_spec = pl.BlockSpec((cfg.tm, d_pad), lambda i, h: (i, 0))
            scratch = [pltpu.VMEM((cfg.tm, d_pad), jnp.bfloat16)]    # cached LN rows
            if not cfg.acc_in_out:
                scratch.append(pltpu.VMEM((cfg.tm, d_pad), jnp.float32))
            dims_sem = ("parallel", "arbitrary")
            weight_bytes = n_row_tiles * (w1_p.size + w2_p.size) * 2  # re-streamed per row tile

        bytes_accessed = (x_p.size * 4 + weight_bytes
                          + (gamma_p.size + beta_p.size + b1_p.size + b2_p.size) * 4
                          + n_pad * d_pad * o_dtype.itemsize)
        cost = pl.CostEstimate(
            flops=2 * n_pad * d_pad * h_pad * 2,    # two matmuls
            transcendentals=n_pad * h_pad,          # sigmoid in Swish
            bytes_accessed=int(bytes_accessed))

        out = pl.pallas_call(
            kernel,
            out_shape=jax.ShapeDtypeStruct((n_pad, d_pad), o_dtype),
            grid_spec=pltpu.PrefetchScalarGridSpec(
                num_scalar_prefetch=0,
                grid=grid,
                in_specs=in_specs,
                out_specs=out_spec,
                scratch_shapes=scratch),
            compiler_params=pltpu.CompilerParams(
                dimension_semantics=dims_sem,
                vmem_limit_bytes=cfg.vmem_limit_bytes),
            cost_estimate=cost,
        )(x_p, gamma_p, beta_p, w1_p, b1_p, w2_p, b2_p)

        return out[:N, :dim].reshape(orig_shape)

    return forward


# ----------------------------- test harness -----------------------------

def _init_params(key, dim):
    """Deterministic init mirroring nn.LayerNorm / nn.Linear (weights pre-transposed)."""
    hidden = 4 * dim
    k1, k2, k3, k4 = jax.random.split(key, 4)
    gamma = jnp.ones((dim,), jnp.float32)
    beta = jnp.zeros((dim,), jnp.float32)
    bound1 = 1.0 / jnp.sqrt(dim)
    w1 = jax.random.uniform(k1, (dim, hidden), jnp.float32, -bound1, bound1)
    b1 = jax.random.uniform(k2, (hidden,), jnp.float32, -bound1, bound1)
    bound2 = 1.0 / jnp.sqrt(hidden)
    w2 = jax.random.uniform(k3, (hidden, dim), jnp.float32, -bound2, bound2)
    b2 = jax.random.uniform(k4, (dim,), jnp.float32, -bound2, bound2)
    return gamma, beta, w1, b1, w2, b2


def _reference(x, gamma, beta, w1, b1, w2, b2, eps=1e-5):
    """Pure-JAX reference using the same bf16 MXU operands / f32 accumulation."""
    mean = jnp.mean(x, axis=-1, keepdims=True)
    var = jnp.mean((x - mean) ** 2, axis=-1, keepdims=True)
    xn = (x - mean) * jax.lax.rsqrt(var + eps) * gamma + beta
    h = jnp.dot(xn.astype(jnp.bfloat16), w1.astype(jnp.bfloat16),
                preferred_element_type=jnp.float32) + b1
    h = h * jax.nn.sigmoid(h)
    return jnp.dot(h.astype(jnp.bfloat16), w2.astype(jnp.bfloat16),
                   preferred_element_type=jnp.float32) + b2


if __name__ == "__main__":
    B, S, dim = 2, 8, 128   # hidden = 512
    key = jax.random.PRNGKey(0)
    kx, kp = jax.random.split(key)
    x = jax.random.normal(kx, (B, S, dim), jnp.float32)
    params = _init_params(kp, dim)
    ref = _reference(x, *params)

    # 1) Default (auto) config: weights become VMEM-resident, single hidden pass.
    ffn = make_feed_forward(*params)
    out = jax.block_until_ready(ffn(x))
    assert out.shape == (B, S, dim) and out.dtype == x.dtype
    err = float(jnp.max(jnp.abs(out - ref)))
    assert jnp.allclose(out, ref, atol=2e-2, rtol=2e-2), f"resident path mismatch {err}"

    # 2) Forced hidden-tiled path, f32 output (accumulates directly in o_ref).
    ffn_tiled = make_feed_forward(*params, force_tiled=True, tm=8, th=128)
    out_t = jax.block_until_ready(ffn_tiled(x))
    err_t = float(jnp.max(jnp.abs(out_t - ref)))
    assert jnp.allclose(out_t, ref, atol=2e-2, rtol=2e-2), f"tiled path mismatch {err_t}"

    # 3) Forced hidden-tiled path, bf16 output (f32 scratch accumulator + narrow store).
    ffn_bf16 = make_feed_forward(*params, force_tiled=True, tm=8, th=128,
                                 out_dtype=jnp.bfloat16)
    out_b = jax.block_until_ready(ffn_bf16(x)).astype(jnp.float32)
    err_b = float(jnp.max(jnp.abs(out_b - ref)))
    assert jnp.allclose(out_b, ref, atol=1e-1, rtol=5e-2), f"bf16-out path mismatch {err_b}"

    print("KERNEL_OK")
</pallas_src>

<mosaic_0001>
module attributes {stable_mosaic.version = 11 : i64} {
  func.func @_ffn_kernel_resident(%arg0: i32, %arg1: memref<16x128xf32, #tpu.memory_space<vmem>>, %arg2: memref<1x128xf32, #tpu.memory_space<vmem>>, %arg3: memref<1x128xf32, #tpu.memory_space<vmem>>, %arg4: memref<128x512xbf16, #tpu.memory_space<vmem>>, %arg5: memref<1x512xf32, #tpu.memory_space<vmem>>, %arg6: memref<512x128xbf16, #tpu.memory_space<vmem>>, %arg7: memref<1x128xf32, #tpu.memory_space<vmem>>, %arg8: memref<16x128xf32, #tpu.memory_space<vmem>>) attributes {dimension_semantics = [#tpu.dimension_semantics<parallel>], iteration_bounds = array<i64: 1>, scalar_prefetch = 0 : i64, scratch_operands = 0 : i64, tpu.core_type = #tpu.core_type<tc>, window_params = [{transform_indices = @transform_0, window_bounds = array<i64: 16, 128>}, {pipeline_mode = #tpu.pipeline_mode<synchronous>, transform_indices = @transform_1, window_bounds = array<i64: 1, 128>}, {pipeline_mode = #tpu.pipeline_mode<synchronous>, transform_indices = @transform_2, window_bounds = array<i64: 1, 128>}, {pipeline_mode = #tpu.pipeline_mode<synchronous>, transform_indices = @transform_3, window_bounds = array<i64: 128, 512>}, {pipeline_mode = #tpu.pipeline_mode<synchronous>, transform_indices = @transform_4, window_bounds = array<i64: 1, 512>}, {pipeline_mode = #tpu.pipeline_mode<synchronous>, transform_indices = @transform_5, window_bounds = array<i64: 512, 128>}, {pipeline_mode = #tpu.pipeline_mode<synchronous>, transform_indices = @transform_6, window_bounds = array<i64: 1, 128>}, {transform_indices = @transform_7, window_bounds = array<i64: 16, 128>}]} {
    %c0 = arith.constant 0 : index
    %c0_0 = arith.constant 0 : index
    %0 = vector.load %arg1[%c0, %c0_0] : memref<16x128xf32, #tpu.memory_space<vmem>>, vector<16x128xf32>
    %c0_1 = arith.constant 0 : index
    %c0_2 = arith.constant 0 : index
    %1 = vector.load %arg2[%c0_1, %c0_2] : memref<1x128xf32, #tpu.memory_space<vmem>>, vector<1x128xf32>
    %c0_3 = arith.constant 0 : index
    %c0_4 = arith.constant 0 : index
    %2 = vector.load %arg3[%c0_3, %c0_4] : memref<1x128xf32, #tpu.memory_space<vmem>>, vector<1x128xf32>
    %cst = arith.constant dense<0.000000e+00> : vector<16xf32>
    %3 = vector.multi_reduction <add>, %0, %cst [1] : vector<16x128xf32> to vector<16xf32>
    %4 = vector.shape_cast %3 : vector<16xf32> to vector<16x1xf32>
    %cst_5 = arith.constant 7.812500e-03 : f32
    %5 = vector.broadcast %cst_5 : f32 to vector<16x1xf32>
    %6 = arith.mulf %4, %5 : vector<16x1xf32>
    %7 = vector.broadcast %6 : vector<16x1xf32> to vector<16x128xf32>
    %8 = arith.subf %0, %7 : vector<16x128xf32>
    %9 = arith.mulf %8, %8 : vector<16x128xf32>
    %cst_6 = arith.constant dense<0.000000e+00> : vector<16xf32>
    %10 = vector.multi_reduction <add>, %9, %cst_6 [1] : vector<16x128xf32> to vector<16xf32>
    %11 = vector.shape_cast %10 : vector<16xf32> to vector<16x1xf32>
    %cst_7 = arith.constant 7.812500e-03 : f32
    %12 = vector.broadcast %cst_7 : f32 to vector<16x1xf32>
    %13 = arith.mulf %11, %12 : vector<16x1xf32>
    %cst_8 = arith.constant 9.99999974E-6 : f32
    %14 = vector.broadcast %cst_8 : f32 to vector<16x1xf32>
    %15 = arith.addf %13, %14 : vector<16x1xf32>
    %16 = math.rsqrt %15 : vector<16x1xf32>
    %17 = vector.broadcast %16 : vector<16x1xf32> to vector<16x128xf32>
    %18 = arith.mulf %8, %17 : vector<16x128xf32>
    %19 = vector.broadcast %1 : vector<1x128xf32> to vector<16x128xf32>
    %20 = arith.mulf %18, %19 : vector<16x128xf32>
    %21 = vector.broadcast %2 : vector<1x128xf32> to vector<16x128xf32>
    %22 = arith.addf %20, %21 : vector<16x128xf32>
    %23 = arith.truncf %22 : vector<16x128xf32> to vector<16x128xbf16>
    %c0_9 = arith.constant 0 : index
    %c0_10 = arith.constant 0 : index
    %24 = vector.load %arg4[%c0_9, %c0_10] : memref<128x512xbf16, #tpu.memory_space<vmem>>, vector<128x512xbf16>
    %cst_11 = arith.constant dense<0.000000e+00> : vector<16x512xf32>
    %25 = tpu.matmul %23, %24, %cst_11 {dimension_numbers = #tpu.dot_dimension_numbers<[1], [0], [0], [1], [0, 0, 1, 1], [], []>} : vector<16x128xbf16>, vector<128x512xbf16>, vector<16x512xf32> -> vector<16x512xf32>
    %c0_12 = arith.constant 0 : index
    %c0_13 = arith.constant 0 : index
    %26 = vector.load %arg5[%c0_12, %c0_13] : memref<1x512xf32, #tpu.memory_space<vmem>>, vector<1x512xf32>
    %27 = vector.broadcast %26 : vector<1x512xf32> to vector<16x512xf32>
    %28 = arith.addf %25, %27 : vector<16x512xf32>
    %29 = arith.negf %28 : vector<16x512xf32>
    %30 = math.exp %29 : vector<16x512xf32>
    %cst_14 = arith.constant 1.000000e+00 : f32
    %31 = vector.broadcast %cst_14 : f32 to vector<16x512xf32>
    %32 = arith.addf %31, %30 : vector<16x512xf32>
    %33 = arith.divf %31, %32 : vector<16x512xf32>
    %34 = arith.mulf %28, %33 : vector<16x512xf32>
    %35 = arith.truncf %34 : vector<16x512xf32> to vector<16x512xbf16>
    %c0_15 = arith.constant 0 : index
    %c0_16 = arith.constant 0 : index
    %36 = vector.load %arg6[%c0_15, %c0_16] : memref<512x128xbf16, #tpu.memory_space<vmem>>, vector<512x128xbf16>
    %cst_17 = arith.constant dense<0.000000e+00> : vector<16x128xf32>
    %37 = tpu.matmul %35, %36, %cst_17 {dimension_numbers = #tpu.dot_dimension_numbers<[1], [0], [0], [1], [0, 0, 1, 1], [], []>} : vector<16x512xbf16>, vector<512x128xbf16>, vector<16x128xf32> -> vector<16x128xf32>
    %c0_18 = arith.constant 0 : index
    %c0_19 = arith.constant 0 : index
    %38 = vector.load %arg7[%c0_18, %c0_19] : memref<1x128xf32, #tpu.memory_space<vmem>>, vector<1x128xf32>
    %39 = vector.broadcast %38 : vector<1x128xf32> to vector<16x128xf32>
    %40 = arith.addf %37, %39 : vector<16x128xf32>
    %c0_20 = arith.constant 0 : index
    %c0_21 = arith.constant 0 : index
    %41 = vector.load %arg8[%c0_20, %c0_21] : memref<16x128xf32, #tpu.memory_space<vmem>>, vector<16x128xf32>
    tpu.vector_store %arg8[%c0_20, %c0_21], %40 {strides = array<i32>} : memref<16x128xf32, #tpu.memory_space<vmem>>, vector<16x128xf32>,
    return
  }
  func.func @transform_0(%arg0: i32) -> (i32, i32) {
    %c0_i32 = arith.constant 0 : i32
    %c0_i32_0 = arith.constant 0 : i32
    return %arg0, %c0_i32 : i32, i32
  }
  func.func @transform_1(%arg0: i32) -> (i32, i32) {
    %c0_i32 = arith.constant 0 : i32
    %c0_i32_0 = arith.constant 0 : i32
    %c0_i32_1 = arith.constant 0 : i32
    return %c0_i32, %c0_i32_0 : i32, i32
  }
  func.func @transform_2(%arg0: i32) -> (i32, i32) {
    %c0_i32 = arith.constant 0 : i32
    %c0_i32_0 = arith.constant 0 : i32
    %c0_i32_1 = arith.constant 0 : i32
    return %c0_i32, %c0_i32_0 : i32, i32
  }
  func.func @transform_3(%arg0: i32) -> (i32, i32) {
    %c0_i32 = arith.constant 0 : i32
    %c0_i32_0 = arith.constant 0 : i32
    %c0_i32_1 = arith.constant 0 : i32
    return %c0_i32, %c0_i32_0 : i32, i32
  }
  func.func @transform_4(%arg0: i32) -> (i32, i32) {
    %c0_i32 = arith.constant 0 : i32
    %c0_i32_0 = arith.constant 0 : i32
    %c0_i32_1 = arith.constant 0 : i32
    return %c0_i32, %c0_i32_0 : i32, i32
  }
  func.func @transform_5(%arg0: i32) -> (i32, i32) {
    %c0_i32 = arith.constant 0 : i32
    %c0_i32_0 = arith.constant 0 : i32
    %c0_i32_1 = arith.constant 0 : i32
    return %c0_i32, %c0_i32_0 : i32, i32
  }
  func.func @transform_6(%arg0: i32) -> (i32, i32) {
    %c0_i32 = arith.constant 0 : i32
    %c0_i32_0 = arith.constant 0 : i32
    %c0_i32_1 = arith.constant 0 : i32
    return %c0_i32, %c0_i32_0 : i32, i32
  }
  func.func @transform_7(%arg0: i32) -> (i32, i32) {
    %c0_i32 = arith.constant 0 : i32
    %c0_i32_0 = arith.constant 0 : i32
    return %arg0, %c0_i32 : i32, i32
  }
}

</mosaic_0001>

<bundles_post_ra>
// kernel: tpu_custom_call.1
= control target key start
LH: loop header
LB: loop body
LE: loop exit
PB: predicated region body
PF: predicated region fallthrough
CT: control target
= control target key end

     0   :  { %12 = vsyncpa [#allocation3], 0  ;;  %s1725_s0 = inlined_call_operand.hbm [shape: f32[16,128], index: 0, kind: input, shape index: {}]   ;;  %s1726_s1 = inlined_call_operand.hbm [shape: f32[1,128], index: 1, kind: input, shape index: {}]   ;;  %s1727_s2 = inlined_call_operand.vmem [shape: f32[1,128], index: 2, kind: input, shape index: {}]   ;;  %s1728_s3 = inlined_call_operand.hbm [shape: bf16[128,512], index: 3, kind: input, shape index: {}]   ;;  %s1729_s4 = inlined_call_operand.hbm [shape: f32[1,512], index: 4, kind: input, shape index: {}]   ;;  %s1730_s5 = inlined_call_operand.hbm [shape: bf16[512,128], index: 5, kind: input, shape index: {}]   ;;  %s1731_s6 = inlined_call_operand.vmem [shape: f32[1,128], index: 6, kind: input, shape index: {}]   ;;  %s1732_s7 = inlined_call_operand.hbm [shape: f32[16,128], index: 7, kind: output, shape index: {}]  }
   0x1   :  { %13 = vsyncpa [#allocation6], 0 }
   0x2   :  { %14 = vsyncpa [#allocation9], 0  ;;  %s34_s26 = sshll.u32 %s1726_s1, 4  ;;  %s35_s26 = int_to_ptr.hbm [resolvable:$true] %s34_s26 }
   0x3   :  { %15 = vsyncpa [#allocation4], 0  ;;  %s1448_s27 = smov [#allocation5]   ;;  %s60_s8 = sshll.u32 %s1729_s4, 4  ;;  %s61_s8 = int_to_ptr.hbm [resolvable:$true] %s60_s8 }
   0x4   :  { %s36_s28 = sshll.u32 %s1448_s27, 4  ;;  %s1449_s9 = smov [#allocation8]   ;;  %s37_s28 = int_to_ptr.vmem [resolvable:$true] %s36_s28 }
   0x5   :  { %39 = dma.hbm_to_vmem [thread:$0]  %s35_s26, 16, %s37_s28, [#allocation6]  }
   0x6   :  { %s62_s10 = sshll.u32 %s1449_s9, 4  ;;  %s20_s13 = sshll.u32 %s1725_s0, 4  ;;  %s63_s10 = int_to_ptr.vmem [resolvable:$true] %s62_s10  ;;  %s21_s13 = int_to_ptr.hbm [resolvable:$true] %s20_s13 }
   0x7   :  { %65 = dma.hbm_to_vmem [thread:$0]  %s61_s8, 64, %s63_s10, [#allocation9]  }
   0x8   :  { %s1450_s1 = smov [#allocation2]   ;;  %s46_s17 = sshll.u32 %s1728_s3, 4  ;;  %s47_s17 = int_to_ptr.hbm [resolvable:$true] %s46_s17 }
   0x9   :  { %s22_s14 = sshll.u32 %s1450_s1, 4  ;;  %s1451_s18 = smov 128   ;;  %s23_s14 = int_to_ptr.vmem [resolvable:$true] %s22_s14 }
   0xa   :  { %s1452_s4 = smov 8   ;;  %s1453_s19 = smov [#allocation7]  }
   0xb   :  { %28 = dma.hbm_to_vmem [thread:$0]  %s21_s13, 256, %s23_s14, [#allocation3], %s1451_s18, %s1451_s18, %s1452_s4  }
   0xc   :  { %s48_s20 = sshll.u32 %s1453_s19, 4  ;;  %s1454_s0 = smov 256   ;;  %s49_s20 = int_to_ptr.vmem [resolvable:$true] %s48_s20 }
   0xd   :  { %s1455_s21 = smov 16   ;;  %s70_s24 = sshll.u32 %s1730_s5, 4  ;;  %s71_s24 = int_to_ptr.hbm [resolvable:$true] %s70_s24 }
   0xe   :  { %54 = dma.hbm_to_vmem [thread:$0]  %s47_s17, 4096, %s49_s20, [#allocation6], %s1454_s0, %s1454_s0, %s1455_s21  }
   0xf   :  { %s1456_s25 = smov [#allocation10]   ;;  %s1457_s26 = smov 64  }
  0x10   :  { %s72_s3 = sshll.u32 %s1456_s25, 4  ;;  %s1458_s27 = smov 4   ;;  %s73_s3 = int_to_ptr.vmem [resolvable:$true] %s72_s3 }
  0x11   :  { %78 = dma.hbm_to_vmem [thread:$0]  %s71_s24, 4096, %s73_s3, [#allocation9], %s1457_s26, %s1457_s26, %s1458_s27  }
  0x12   :  { %1440 = dma.done.wait [#allocation3], 256  }
  0x13   :  { %1441 = vsyncadd [#allocation3], 4294967040 }
  0x14   :  { %1442 = dma.done.wait [#allocation6], 4112  }
  0x15   :  { %1443 = vsyncadd [#allocation6], 4294963184 }
  0x16   :  { %1444 = dma.done.wait [#allocation9], 4160  }
  0x17   :  { %1445 = vsyncadd [#allocation9], 4294963136  ;;  %v101_v0 = vld [vmem:[#allocation2] sm:$0xff]  ;;  %v102_v1 = vld [vmem:[#allocation2 + $0x8] sm:$0xff]  ;;  %s1459_s30 = smov [#allocation11]  }
  0x18   :  { %105 = vadd.xlane.f32.xlu0 %v101_v0  ;;  %v1031_v10 = vld [vmem:[#allocation7 + $0xe0] sm:$0xf]  ;;  %v1211_v11 = vld [vmem:[#allocation7 + $0xec] sm:$0xf0]  ;;  %v1209_v12 = vld [vmem:[#allocation7 + $0xe4] sm:$0xf] }
  0x19   :  { %v1032_v13 = vor.u32 %v1211_v11, %v1031_v10  ;;  %v1033_v14 = vld [vmem:[#allocation7 + $0xf0] sm:$0xf0]  ;;  %v1039_v15 = vld [vmem:[#allocation7 + $0xe8] sm:$0xf]  ;;  %v1212_v16 = vld [vmem:[#allocation7 + $0xf4] sm:$0xf0] }
  0x1a   :  { %v1036_v17 = vor.u32 %v1209_v12, %v1033_v14  ;;  %v1040_v18 = vor.u32 %v1212_v16, %v1039_v15  ;;  %v1210_v19 = vld [vmem:[#allocation7 + $0xec] sm:$0xf]  ;;  %v1041_v20 = vld [vmem:[#allocation7 + $0xf8] sm:$0xf0]  ;;  %v1015_v22 = vld [vmem:[#allocation7 + $0xc0] sm:$0xf] }
  0x1b   :  { %358 = vmatpush.bf16.msra.mxu0 %v1032_v13  ;;  %v1044_v21 = vor.u32 %v1210_v19, %v1041_v20  ;;  %v1207_v23 = vld [vmem:[#allocation7 + $0xcc] sm:$0xf0]  ;;  %v1205_v24 = vld [vmem:[#allocation7 + $0xc4] sm:$0xf]  ;;  %v1017_v26 = vld [vmem:[#allocation7 + $0xd0] sm:$0xf0] }
  0x1c   :  { %372 = vmatpush.bf16.msra.mxu1 %v1036_v17  ;;  %386 = vmatpush.bf16.msra.mxu2 %v1040_v18  ;;  %v1016_v25 = vor.u32 %v1207_v23, %v1015_v22  ;;  %v1023_v27 = vld [vmem:[#allocation7 + $0xc8] sm:$0xf]  ;;  %v1208_v28 = vld [vmem:[#allocation7 + $0xd4] sm:$0xf0]  ;;  %v1020_v29 = vor.u32 %v1205_v24, %v1017_v26  ;;  %v1206_v31 = vld [vmem:[#allocation7 + $0xcc] sm:$0xf] }
  0x1d   :  { %400 = vmatpush.bf16.msra.mxu3 %v1044_v21  ;;  %v1024_v30 = vor.u32 %v1208_v28, %v1023_v27  ;;  %v1025_v32 = vld [vmem:[#allocation7 + $0xd8] sm:$0xf0]  ;;  %v999_v34 = vld [vmem:[#allocation7 + $0xa0] sm:$0xf]  ;;  %v1203_v35 = vld [vmem:[#allocation7 + $0xac] sm:$0xf0] }
  0x1e   :  { %v1028_v33 = vor.u32 %v1206_v31, %v1025_v32  ;;  %v1201_v36 = vld [vmem:[#allocation7 + $0xa4] sm:$0xf]  ;;  %v1000_v37 = vor.u32 %v1203_v35, %v999_v34  ;;  %v1001_v38 = vld [vmem:[#allocation7 + $0xb0] sm:$0xf0]  ;;  %v1007_v39 = vld [vmem:[#allocation7 + $0xa8] sm:$0xf] }
  0x1f   :  { %359 = vmatpush.bf16.msra.mxu0 %v1016_v25  ;;  %v1204_v40 = vld [vmem:[#allocation7 + $0xb4] sm:$0xf0]  ;;  %v1004_v41 = vor.u32 %v1201_v36, %v1001_v38  ;;  %v1202_v43 = vld [vmem:[#allocation7 + $0xac] sm:$0xf]  ;;  %v1009_v44 = vld [vmem:[#allocation7 + $0xb8] sm:$0xf0] }
  0x20   :  { %107 = vadd.xlane.f32.xlu0 %v102_v1  ;;  %373 = vmatpush.bf16.msra.mxu1 %v1020_v29  ;;  %v1008_v42 = vor.u32 %v1204_v40, %v1007_v39  ;;  %v1012_v45 = vor.u32 %v1202_v43, %v1009_v44  ;;  %v983_v46 = vld [vmem:[#allocation7 + $0x80] sm:$0xf]  ;;  %v1199_v47 = vld [vmem:[#allocation7 + $0x8c] sm:$0xf0]  ;;  %v1197_v48 = vld [vmem:[#allocation7 + $0x84] sm:$0xf] }
  0x21   :  { %387 = vmatpush.bf16.msra.mxu2 %v1024_v30  ;;  %401 = vmatpush.bf16.msra.mxu3 %v1028_v33  ;;  %v984_v49 = vor.u32 %v1199_v47, %v983_v46  ;;  %v985_v50 = vld [vmem:[#allocation7 + $0x90] sm:$0xf0]  ;;  %v991_v51 = vld [vmem:[#allocation7 + $0x88] sm:$0xf]  ;;  %v1200_v52 = vld [vmem:[#allocation7 + $0x94] sm:$0xf0] }
  0x22   :  { %v988_v53 = vor.u32 %v1197_v48, %v985_v50  ;;  %v992_v54 = vor.u32 %v1200_v52, %v991_v51  ;;  %v1198_v55 = vld [vmem:[#allocation7 + $0x8c] sm:$0xf]  ;;  %v993_v56 = vld [vmem:[#allocation7 + $0x98] sm:$0xf0]  ;;  %v967_v58 = vld [vmem:[#allocation7 + $0x60] sm:$0xf] }
  0x23   :  { %360 = vmatpush.bf16.msra.mxu0 %v1000_v37  ;;  %v996_v57 = vor.u32 %v1198_v55, %v993_v56  ;;  %v1195_v59 = vld [vmem:[#allocation7 + $0x6c] sm:$0xf0]  ;;  %v1193_v60 = vld [vmem:[#allocation7 + $0x64] sm:$0xf]  ;;  %v969_v62 = vld [vmem:[#allocation7 + $0x70] sm:$0xf0] }
  0x24   :  { %374 = vmatpush.bf16.msra.mxu1 %v1004_v41  ;;  %v968_v61 = vor.u32 %v1195_v59, %v967_v58  ;;  %v975_v63 = vld [vmem:[#allocation7 + $0x68] sm:$0xf]  ;;  %v1189_v10 = vld [vmem:[#allocation7 + $0x44] sm:$0xf]  ;;  %v953_v12 = vld [vmem:[#allocation7 + $0x50] sm:$0xf0] }
  0x25   :  { %388 = vmatpush.bf16.msra.mxu2 %v1008_v42  ;;  %402 = vmatpush.bf16.msra.mxu3 %v1012_v45  ;;  %v959_v13 = vld [vmem:[#allocation7 + $0x48] sm:$0xf]  ;;  %v1192_v14 = vld [vmem:[#allocation7 + $0x54] sm:$0xf0]  ;;  %v956_v15 = vor.u32 %v1189_v10, %v953_v12  ;;  %v1190_v17 = vld [vmem:[#allocation7 + $0x4c] sm:$0xf] }
  0x26   :  { %v960_v16 = vor.u32 %v1192_v14, %v959_v13  ;;  %v961_v18 = vld [vmem:[#allocation7 + $0x58] sm:$0xf0]  ;;  %v935_v20 = vld [vmem:[#allocation7 + $0x20] sm:$0xf]  ;;  %v1187_v21 = vld [vmem:[#allocation7 + $0x2c] sm:$0xf0] }
  0x27   :  { %361 = vmatpush.bf16.msra.mxu0 %v984_v49  ;;  %v964_v19 = vor.u32 %v1190_v17, %v961_v18  ;;  %v1185_v22 = vld [vmem:[#allocation7 + $0x24] sm:$0xf]  ;;  %v936_v23 = vor.u32 %v1187_v21, %v935_v20  ;;  %v937_v24 = vld [vmem:[#allocation7 + $0x30] sm:$0xf0]  ;;  %v943_v25 = vld [vmem:[#allocation7 + $0x28] sm:$0xf] }
  0x28   :  { %375 = vmatpush.bf16.msra.mxu1 %v988_v53  ;;  %v1188_v26 = vld [vmem:[#allocation7 + $0x34] sm:$0xf0]  ;;  %v940_v27 = vor.u32 %v1185_v22, %v937_v24  ;;  %v1186_v29 = vld [vmem:[#allocation7 + $0x2c] sm:$0xf]  ;;  %v945_v30 = vld [vmem:[#allocation7 + $0x38] sm:$0xf0] }
  0x29   :  { %389 = vmatpush.bf16.msra.mxu2 %v992_v54  ;;  %403 = vmatpush.bf16.msra.mxu3 %v996_v57  ;;  %v944_v28 = vor.u32 %v1188_v26, %v943_v25  ;;  %v948_v32 = vor.u32 %v1186_v29, %v945_v30  ;;  %v919_v34 = vld [vmem:[#allocation7] sm:$0xf]  ;;  %v1183_v35 = vld [vmem:[#allocation7 + $0xc] sm:$0xf0]  ;;  %v1181_v37 = vld [vmem:[#allocation7 + $0x4] sm:$0xf] }
  0x2a   :  { %v920_v36 = vor.u32 %v1183_v35, %v919_v34  ;;  %v921_v38 = vld [vmem:[#allocation7 + $0x10] sm:$0xf0]  ;;  %v927_v39 = vld [vmem:[#allocation7 + $0x8] sm:$0xf]  ;;  %v1184_v42 = vld [vmem:[#allocation7 + $0x14] sm:$0xf0] }
  0x2b   :  { %362 = vmatpush.bf16.msra.mxu0 %v968_v61  ;;  %v924_v41 = vor.u32 %v1181_v37, %v921_v38  ;;  %v1182_v43 = vld [vmem:[#allocation7 + $0xc] sm:$0xf]  ;;  %v928_v44 = vor.u32 %v1184_v42, %v927_v39  ;;  %v929_v45 = vld [vmem:[#allocation7 + $0x18] sm:$0xf0]  ;;  %v1531_v12 = vld [vmem:[#allocation8] sm:$0xf] }
  0x2c   :  { %v932_v46 = vor.u32 %v1182_v43, %v929_v45  ;;  %v1227_v13 = vld [vmem:[#allocation10 + $0x70] sm:$0xff]  ;;  %v190_v14 = vperm.slane %v1531_v12, 0  ;;  %v1244_v17 = vld [vmem:[#allocation10 + $0xf8] sm:$0xff]  ;;  %v1218_v18 = vld [vmem:[#allocation10 + $0x28] sm:$0xff]  ;;  %v192_v30 = vperm.slane %v1531_v12, 2  ;;  %s900_s8 = sshll.u32 %s1459_s30, 4  ;;  %s901_s8 = int_to_ptr.vmem [resolvable:$true] %s900_s8 }
  0x2d   :  { %v1235_v24 = vld [vmem:[#allocation10 + $0xb0] sm:$0xff]  ;;  %v1225_v29 = vld [vmem:[#allocation10 + $0x60] sm:$0xff]  ;;  %v1224_v37 = vld [vmem:[#allocation10 + $0x58] sm:$0xff] }
  0x2e   :  { %v1243_v25 = vld [vmem:[#allocation10 + $0xf0] sm:$0xff]  ;;  %v1241_v45 = vld [vmem:[#allocation10 + $0xe0] sm:$0xff] }
  0x8b   :  { %v106_v2 = vpop.xlane.xlu0 %105 }
  0x8c   :  { %v109_v3 = vmul.f32 0.0078125, %v106_v2 }
  0x8e   :  { %v1518_v4 = vsub.f32 %v101_v0, %v109_v3  ;;  %v1196_v0 = vld [vmem:[#allocation7 + $0x74] sm:$0xf0]  ;;  %v1194_v3 = vld [vmem:[#allocation7 + $0x6c] sm:$0xf] }
  0x8f   :  { %v976_v2 = vor.u32 %v1196_v0, %v975_v63  ;;  %v1257_v63 = vld [vmem:[#allocation5] ss:$0 sm:$0xff] }
  0x90   :  { %v113_v5 = vmul.f32 %v1518_v4, %v1518_v4 }
  0x91   :  { %390 = vmatpush.bf16.msra.mxu2 %v976_v2 }
  0x92   :  { %115 = vadd.xlane.f32.xlu1 %v113_v5  ;;  %v977_v5 = vld [vmem:[#allocation7 + $0x78] sm:$0xf0] }
  0x93   :  { %v108_v6 = vpop.xlane.xlu0 %107 }
  0x94   :  { %v110_v7 = vmul.f32 0.0078125, %v108_v6  ;;  %v980_v6 = vor.u32 %v1194_v3, %v977_v5  ;;  %v1258_v5 = vld [vmem:[%s1727_s2] ss:$0 sm:$0xff] }
  0x95   :  { %391 = vmatpush.bf16.msra.mxu2 %v960_v16  ;;  %v1236_v16 = vld [vmem:[#allocation10 + $0xb8] sm:$0xff] }
  0x96   :  { %v1522_v8 = vsub.f32 %v102_v1, %v110_v7  ;;  %v972_v1 = vor.u32 %v1193_v60, %v969_v62  ;;  %v951_v7 = vld [vmem:[#allocation7 + $0x40] sm:$0xf]  ;;  %404 = vmatpush.bf16.msra.mxu3 %v980_v6 }
  0x98   :  { %v114_v9 = vmul.f32 %v1522_v8, %v1522_v8  ;;  %376 = vmatpush.bf16.msra.mxu1 %v972_v1 }
  0x99   :  { %392 = vmatpush.bf16.msra.mxu2 %v944_v28  ;;  %v1217_v28 = vld [vmem:[#allocation10 + $0x20] sm:$0xff] }
  0x9a   :  { %117 = vadd.xlane.f32.xlu1 %v114_v9  ;;  %v1191_v9 = vld [vmem:[#allocation7 + $0x4c] sm:$0xf0]  ;;  %405 = vmatpush.bf16.msra.mxu3 %v964_v19 }
  0x9b   :  { %v952_v11 = vor.u32 %v1191_v9, %v951_v7  ;;  %v1226_v19 = vld [vmem:[#allocation10 + $0x68] sm:$0xff] }
  0x9c   :  { %377 = vmatpush.bf16.msra.mxu1 %v956_v15  ;;  %v191_v15 = vperm.slane %v1531_v12, 1 }
  0x9d   :  { %363 = vmatpush.bf16.msra.mxu0 %v952_v11  ;;  %393 = vmatpush.bf16.msra.mxu2 %v928_v44  ;;  %v1228_v11 = vld [vmem:[#allocation10 + $0x78] sm:$0xff]  ;;  %v1233_v44 = vld [vmem:[#allocation10 + $0xa0] sm:$0xff] }
  0x9e   :  { %406 = vmatpush.bf16.msra.mxu3 %v948_v32  ;;  %v1234_v32 = vld [vmem:[#allocation10 + $0xa8] sm:$0xff] }
  0xa0   :  { %378 = vmatpush.bf16.msra.mxu1 %v940_v27 }
  0xa1   :  { %364 = vmatpush.bf16.msra.mxu0 %v936_v23  ;;  %866 = vmatpush.bf16.msrb.mxu2 %v1236_v16 }
  0xa2   :  { %407 = vmatpush.bf16.msra.mxu3 %v932_v46 }
  0xa4   :  { %379 = vmatpush.bf16.msra.mxu1 %v924_v41 }
  0xa5   :  { %365 = vmatpush.bf16.msra.mxu0 %v920_v36  ;;  %867 = vmatpush.bf16.msrb.mxu2 %v1235_v24  ;;  %v1216_v36 = vld [vmem:[#allocation10 + $0x18] sm:$0xff] }
  0xa6   :  { %880 = vmatpush.bf16.msrb.mxu3 %v1244_v17 }
  0xa8   :  { %852 = vmatpush.bf16.msrb.mxu1 %v1228_v11 }
  0xa9   :  { %868 = vmatpush.bf16.msrb.mxu2 %v1234_v32 }
  0xaa   :  { %881 = vmatpush.bf16.msrb.mxu3 %v1243_v25 }
  0xac   :  { %853 = vmatpush.bf16.msrb.mxu1 %v1227_v13  ;;  %v1238_v13 = vld [vmem:[#allocation10 + $0xc8] sm:$0xff] }
  0xad   :  { %869 = vmatpush.bf16.msrb.mxu2 %v1233_v44 }
  0xb0   :  { %854 = vmatpush.bf16.msrb.mxu1 %v1226_v19 }
  0xb4   :  { %855 = vmatpush.bf16.msrb.mxu1 %v1225_v29 }
  0xb8   :  { %856 = vmatpush.bf16.msrb.mxu1 %v1224_v37 }
 0x105   :  { %v116_v31 = vpop.xlane.xlu1 %115 }
 0x106   :  { %v119_v33 = vmul.f32 0.0078125, %v116_v31  ;;  %v193_v31 = vperm.slane %v1531_v12, 3 }
 0x108   :  { %v121_v40 = vadd.f32 1e-05, %v119_v33  ;;  %v1242_v33 = vld [vmem:[#allocation10 + $0xe8] sm:$0xff] }
 0x109   :  { %882 = vmatpush.bf16.msrb.mxu3 %v1242_v33 }
 0x10a   :  { %1260 = vrsqrt.f32 %v121_v40  ;;  %vm129_vm1 = vweird.f32 %v121_v40 }
 0x10d   :  { %v118_v47 = vpop.xlane.xlu1 %117  ;;  %883 = vmatpush.bf16.msrb.mxu3 %v1241_v45 }
 0x10e   :  { %v120_v48 = vmul.f32 0.0078125, %v118_v47 }
 0x110   :  { %v1261_v49 = vpop.eup %1260  ;;  %v122_v50 = vadd.f32 1e-05, %v120_v48 }
 0x111   :  { %v124_v51 = vmul.f32 %v1261_v49, %v121_v40  ;;  %vm130_vm0 = vweird.f32 %v1261_v49 }
 0x112   :  { %1262 = vrsqrt.f32 %v122_v50  ;;  %vm131_vm2 = vmor %vm129_vm1, %vm130_vm0  ;;  %vm139_vm4 = vweird.f32 %v122_v50 }
 0x113   :  { %v125_v52 = vmul.f32 %v1261_v49, %v124_v51 }
 0x115   :  { %v126_v53 = vmul.f32 0.5, %v125_v52 }
 0x117   :  { %v127_v54 = vsub.f32 1.5, %v126_v53 }
 0x118   :  { %v1263_v55 = vpop.eup %1262 }
 0x119   :  { %v128_v56 = vmul.f32 %v1261_v49, %v127_v54  ;;  %v134_v57 = vmul.f32 %v1263_v55, %v122_v50  ;;  %vm140_vm3 = vweird.f32 %v1263_v55  ;;  %v1223_v50 = vld [vmem:[#allocation10 + $0x50] sm:$0xff] }
 0x11a   :  { %vm141_vm5 = vmor %vm139_vm4, %vm140_vm3  ;;  %857 = vmatpush.bf16.msrb.mxu1 %v1223_v50 }
 0x11b   :  { %v135_v58 = vmul.f32 %v1263_v55, %v134_v57  ;;  %v132_v59 = vsel %vm131_vm2, %v1261_v49, %v128_v56  ;;  %v1215_v49 = vld [vmem:[#allocation10 + $0x10] sm:$0xff]  ;;  %v1232_v56 = vld [vmem:[#allocation10 + $0x98] sm:$0xff] }
 0x11c   :  { %v143_v62 = vmul.f32 %v132_v59, %v1518_v4  ;;  %v1220_v4 = vld [vmem:[#allocation10 + $0x38] sm:$0xff]  ;;  %870 = vmatpush.bf16.msrb.mxu2 %v1232_v56 }
 0x11d   :  { %v136_v60 = vmul.f32 0.5, %v135_v58  ;;  %838 = vmatpush.bf16.msrb.mxu0 %v1220_v4  ;;  %v1240_v57 = vld [vmem:[#allocation10 + $0xd8] sm:$0xff] }
 0x11e   :  { %v148_v3 = vmul.f32 %v1257_v63, %v143_v62  ;;  %884 = vmatpush.bf16.msrb.mxu3 %v1240_v57 }
 0x11f   :  { %v137_v61 = vsub.f32 1.5, %v136_v60  ;;  %v1214_v60 = vld [vmem:[#allocation10 + $0x8] sm:$0xff] }
 0x120   :  { %v153_v7 = vadd.f32 %v1258_v5, %v148_v3 }
 0x121   :  { %v138_v0 = vmul.f32 %v1263_v55, %v137_v61  ;;  %v1222_v61 = vld [vmem:[#allocation10 + $0x48] sm:$0xff] }
 0x122   :  { %858 = vmatpush.bf16.msrb.mxu1 %v1222_v61 }
 0x123   :  { %v142_v1 = vsel %vm141_vm5, %v1263_v55, %v138_v0  ;;  %v1239_v0 = vld [vmem:[#allocation10 + $0xd0] sm:$0xff] }
 0x124   :  { %v144_v2 = vmul.f32 %v142_v1, %v1522_v8  ;;  %v1219_v8 = vld [vmem:[#allocation10 + $0x30] sm:$0xff]  ;;  %885 = vmatpush.bf16.msrb.mxu3 %v1239_v0 }
 0x125   :  { %839 = vmatpush.bf16.msrb.mxu0 %v1219_v8  ;;  %v1230_v8 = vld [vmem:[#allocation10 + $0x88] sm:$0xff] }
 0x126   :  { %v149_v6 = vmul.f32 %v1257_v63, %v144_v2  ;;  %v1231_v63 = vld [vmem:[#allocation10 + $0x90] sm:$0xff] }
 0x127   :  { %871 = vmatpush.bf16.msrb.mxu2 %v1231_v63 }
 0x128   :  { %v154_v9 = vadd.f32 %v1258_v5, %v149_v6  ;;  %886 = vmatpush.bf16.msrb.mxu3 %v1238_v13 }
 0x129   :  { %840 = vmatpush.bf16.msrb.mxu0 %v1218_v18 }
 0x12a   :  { %v155_v10 = vpack.c.bf16 %v154_v9, %v153_v7  ;;  %v1213_v7 = vld [vmem:[#allocation10] sm:$0xff] }
 0x12b   :  { %v1221_v9 = vld [vmem:[#allocation10 + $0x40] sm:$0xff]  ;;  %872 = vmatpush.bf16.msrb.mxu2 %v1230_v8 }
 0x12c   :  { %366 = vmatmul.bf16.vlgmr.msra.gmra.mxu0 %v155_v10  ;;  %380 = vmatmul.bf16.vlgmr.msra.gmra.mxu1 %v155_v10 }
 0x12d   :  { %394 = vmatmul.bf16.vlgmr.msra.gmra.mxu2 %v155_v10  ;;  %408 = vmatmul.bf16.vlgmr.msra.gmra.mxu3 %v155_v10 }
 0x12e   :  { %841 = vmatpush.bf16.msrb.mxu0 %v1217_v28  ;;  %859 = vmatpush.bf16.msrb.mxu1 %v1221_v9 }
 0x132   :  { %842 = vmatpush.bf16.msrb.mxu0 %v1216_v36 }
 0x136   :  { %843 = vmatpush.bf16.msrb.mxu0 %v1215_v49 }
 0x13a   :  { %844 = vmatpush.bf16.msrb.mxu0 %v1214_v60 }
 0x13e   :  { %845 = vmatpush.bf16.msrb.mxu0 %v1213_v7 }
 0x1a9   :  { %v367_v20 = vpop.f32.mrf.mxu0  ;;  %v381_v21 = vpop.f32.mrf.mxu1 }
 0x1aa   :  { %v1535_v22 = vadd.f32 %v367_v20, %v190_v14  ;;  %v1537_v23 = vadd.f32 %v381_v21, %v191_v15  ;;  %v1229_v20 = vld [vmem:[#allocation10 + $0x80] sm:$0xff] }
 0x1ab   :  { %v1237_v21 = vld [vmem:[#allocation10 + $0xc0] sm:$0xff]  ;;  %873 = vmatpush.bf16.msrb.mxu2 %v1229_v20 }
 0x1ac   :  { %v1045_v26 = vmul.f32 -1.442695, %v1535_v22  ;;  %v1046_v27 = vmul.f32 -1.442695, %v1537_v23  ;;  %887 = vmatpush.bf16.msrb.mxu3 %v1237_v21 }
 0x1ae   :  { %1264 = vpow2.f32 %v1045_v26 }
 0x1af   :  { %1266 = vpow2.f32 %v1046_v27 }
 0x1b0   :  { %v395_v34 = vpop.f32.mrf.mxu2  ;;  %v409_v35 = vpop.f32.mrf.mxu3 }
 0x1b1   :  { %v1543_v38 = vadd.f32 %v395_v34, %v192_v30  ;;  %v1545_v39 = vadd.f32 %v409_v35, %v193_v31  ;;  %v369_v40 = vpop.f32.mrf.mxu0  ;;  %v383_v41 = vpop.f32.mrf.mxu1 }
 0x1b2   :  { %v1547_v42 = vadd.f32 %v369_v40, %v190_v14  ;;  %v1549_v43 = vadd.f32 %v383_v41, %v191_v15 }
 0x1b3   :  { %v1047_v46 = vmul.f32 -1.442695, %v1543_v38  ;;  %v1048_v47 = vmul.f32 -1.442695, %v1545_v39 }
 0x1b4   :  { %v1265_v48 = vpop.eup %1264  ;;  %v1049_v53 = vmul.f32 -1.442695, %v1547_v42  ;;  %v1050_v55 = vmul.f32 -1.442695, %v1549_v43 }
 0x1b5   :  { %v1267_v51 = vpop.eup %1266  ;;  %v1553_v52 = vadd.f32 1.0, %v1265_v48  ;;  %1268 = vpow2.f32 %v1047_v46 }
 0x1b6   :  { %v1556_v54 = vadd.f32 1.0, %v1267_v51  ;;  %1270 = vpow2.f32 %v1048_v47 }
 0x1b7   :  { %1272 = vrcp.f32 %v1553_v52  ;;  %v455_v26 = vand.u32 2147483647, %v1553_v52  ;;  %v457_v29 = vand.u32 2147483648, %v1553_v52  ;;  %vm451_vm6 = vweird.f32 %v1553_v52 }
 0x1b8   :  { %1274 = vrcp.f32 %v1556_v54  ;;  %v397_v58 = vpop.f32.mrf.mxu2  ;;  %v411_v59 = vpop.f32.mrf.mxu3  ;;  %v472_v32 = vand.u32 2147483648, %v1556_v54  ;;  %vm466_vm8 = vweird.f32 %v1556_v54 }
 0x1b9   :  { %1276 = vpow2.f32 %v1049_v53  ;;  %v1561_v62 = vadd.f32 %v397_v58, %v192_v30  ;;  %v1563_v2 = vadd.f32 %v411_v59, %v193_v31  ;;  %v470_v30 = vand.u32 2147483647, %v1556_v54 }
 0x1ba   :  { %1278 = vpow2.f32 %v1050_v55  ;;  %vm1600_vm7 = vcmp.eq.f32.partialorder %v455_v26, 8.507059e+37  ;;  %v458_v41 = vor.u32 1.1754944e-38, %v457_v29  ;;  %v473_v47 = vor.u32 1.1754944e-38, %v472_v32 }
 0x1bb   :  { %v1269_v1 = vpop.eup %1268  ;;  %v1051_v6 = vmul.f32 -1.442695, %v1561_v62  ;;  %v1052_v16 = vmul.f32 -1.442695, %v1563_v2  ;;  %vm1608_vm10 = vcmp.eq.f32.partialorder %v470_v30, 8.507059e+37 }
 0x1bc   :  { %v1271_v3 = vpop.eup %1270  ;;  %v1565_v5 = vadd.f32 1.0, %v1269_v1 }
 0x1bd   :  { %v1568_v10 = vpop.eup %1272  ;;  %v1570_v4 = vadd.f32 1.0, %v1271_v3 }
 0x1be   :  { %v1572_v11 = vpop.eup %1274  ;;  %v447_v12 = vmul.f32 %v1568_v10, %v1553_v52  ;;  %1280 = vrcp.f32 %v1565_v5  ;;  %v487_v37 = vand.u32 2147483648, %v1565_v5  ;;  %vm452_vm9 = vweird.f32 %v1568_v10 }
 0x1bf   :  { %v1277_v14 = vpop.eup %1276  ;;  %v462_v15 = vmul.f32 %v1572_v11, %v1556_v54  ;;  %1282 = vpow2.f32 %v1051_v6  ;;  %vm467_vm11 = vweird.f32 %v1572_v11  ;;  %vm481_vm12 = vweird.f32 %v1565_v5  ;;  %vm1622_vm13 = vmor %vm451_vm6, %vm452_vm9 }
 0x1c0   :  { %v1279_v17 = vpop.eup %1278  ;;  %v448_v18 = vsub.f32 1.0, %v447_v12  ;;  %1284 = vrcp.f32 %v1570_v4  ;;  %v1581_v24 = vadd.f32 1.0, %v1277_v14  ;;  %v485_v56 = vand.u32 2147483647, %v1565_v5  ;;  %vm1638_vm14 = vmor %vm466_vm8, %vm467_vm11 }
 0x1c1   :  { %v463_v19 = vsub.f32 1.0, %v462_v15  ;;  %v1583_v25 = vadd.f32 1.0, %v1279_v17  ;;  %1286 = vpow2.f32 %v1052_v16  ;;  %v1627_v57 = vor.u32 1.1754944e-38, %v487_v37 }
 0x1c2   :  { %v449_v28 = vmul.f32 %v1568_v10, %v448_v18  ;;  %1288 = vrcp.f32 %v1581_v24  ;;  %v515_v51 = vand.u32 2147483647, %v1581_v24  ;;  %v500_v58 = vand.u32 2147483647, %v1570_v4 }
 0x1c3   :  { %v464_v31 = vmul.f32 %v1572_v11, %v463_v19  ;;  %1290 = vrcp.f32 %v1583_v25  ;;  %vm511_vm15 = vweird.f32 %v1581_v24  ;;  %v517_v9 = vand.u32 2147483648, %v1581_v24 }
 0x1c4   :  { %v1586_v27 = vpop.eup %1280  ;;  %v450_v40 = vadd.f32 %v1568_v10, %v449_v28  ;;  %vm1652_vm1 = vcmp.eq.f32.partialorder %v515_v51, 8.507059e+37  ;;  %vm496_vm3 = vweird.f32 %v1570_v4  ;;  %v530_v13 = vand.u32 2147483647, %v1583_v25 }
 0x1c5   :  { %v477_v33 = vmul.f32 %v1586_v27, %v1565_v5  ;;  %v1283_v34 = vpop.eup %1282  ;;  %v465_v46 = vadd.f32 %v1572_v11, %v464_v31  ;;  %vm482_vm0 = vweird.f32 %v1586_v27  ;;  %v532_v14 = vand.u32 2147483648, %v1583_v25 }
 0x1c6   :  { %v1597_v35 = vpop.eup %1284  ;;  %v1618_v53 = vadd.f32 1.0, %v1283_v34  ;;  %v454_v61 = vsel %vm1622_vm13, %v1568_v10, %v450_v40  ;;  %v518_v21 = vor.u32 1.1754944e-38, %v517_v9  ;;  %vm526_vm6 = vweird.f32 %v1583_v25 }
 0x1c7   :  { %v1287_v45 = vpop.eup %1286  ;;  %v478_v48 = vsub.f32 1.0, %v477_v33  ;;  %v492_v50 = vmul.f32 %v1597_v35, %v1570_v4  ;;  %v469_v0 = vsel %vm1638_vm14, %v1572_v11, %v465_v46  ;;  %v459_v10 = vsel %vm1600_vm7, %v458_v41, %v454_v61  ;;  %vm1675_vm7 = vmor %vm481_vm12, %vm482_vm0 }
 0x1c8   :  { %v1289_v49 = vpop.eup %1288  ;;  %1292 = vrcp.f32 %v1618_v53  ;;  %v1644_v63 = vadd.f32 1.0, %v1287_v45  ;;  %v474_v8 = vsel %vm1608_vm10, %v473_v47, %v469_v0  ;;  %v566_v19 = vmul.f32 %v459_v10, %v1535_v22 }
 0x1c9   :  { %v507_v59 = vmul.f32 %v1289_v49, %v1581_v24  ;;  %v1291_v60 = vpop.eup %1290  ;;  %v479_v1 = vmul.f32 %v1586_v27, %v478_v48  ;;  %v493_v54 = vsub.f32 1.0, %v492_v50  ;;  %vm512_vm2 = vweird.f32 %v1289_v49 }
 0x1ca   :  { %v522_v6 = vmul.f32 %v1291_v60, %v1583_v25  ;;  %1294 = vrcp.f32 %v1644_v63  ;;  %vm527_vm4 = vweird.f32 %v1291_v60  ;;  %vm513_vm5 = vmor %vm511_vm15, %vm512_vm2  ;;  %vm497_vm8 = vweird.f32 %v1597_v35 }
 0x1cb   :  { %v508_v3 = vsub.f32 1.0, %v507_v59  ;;  %v480_v15 = vadd.f32 %v1586_v27, %v479_v1  ;;  %v494_v20 = vmul.f32 %v1597_v35, %v493_v54  ;;  %v567_v24 = vmul.f32 %v474_v8, %v1537_v23  ;;  %vm528_vm9 = vmor %vm526_vm6, %vm527_vm4 }
 0x1cc   :  { %v523_v11 = vsub.f32 1.0, %v522_v6  ;;  %vm531_vm10 = vcmp.eq.f32.partialorder %v530_v13, 8.507059e+37  ;;  %v533_v25 = vor.u32 1.1754944e-38, %v532_v14  ;;  %v545_v23 = vand.u32 2147483647, %v1618_v53  ;;  %vm1700_vm14 = vmor %vm496_vm3, %vm497_vm8 }
 0x1cd   :  { %v509_v12 = vmul.f32 %v1289_v49, %v508_v3  ;;  %v484_v5 = vsel %vm1675_vm7, %v1586_v27, %v480_v15  ;;  %v495_v36 = vadd.f32 %v1597_v35, %v494_v20  ;;  %v547_v40 = vand.u32 2147483648, %v1618_v53 }
 0x1ce   :  { %v524_v17 = vmul.f32 %v1291_v60, %v523_v11  ;;  %v1293_v18 = vpop.eup %1292  ;;  %vm486_vm12 = vcmp.eq.f32.partialorder %v485_v56, 8.507059e+37  ;;  %v502_v27 = vand.u32 2147483648, %v1570_v4  ;;  %vm541_vm13 = vweird.f32 %v1618_v53 }
 0x1cf   :  { %v510_v16 = vadd.f32 %v1289_v49, %v509_v12  ;;  %v537_v29 = vmul.f32 %v1293_v18, %v1618_v53  ;;  %vm542_vm11 = vweird.f32 %v1293_v18  ;;  %v489_v46 = vsel %vm486_vm12, %v1627_v57, %v484_v5 }
 0x1d0   :  { %v525_v22 = vadd.f32 %v1291_v60, %v524_v17  ;;  %v1295_v34 = vpop.eup %1294  ;;  %v499_v50 = vsel %vm1700_vm14, %v1597_v35, %v495_v36  ;;  %vm543_vm15 = vmor %vm541_vm13, %vm542_vm11  ;;  %vm546_vm0 = vcmp.eq.f32.partialorder %v545_v23, 8.507059e+37  ;;  %v548_v51 = vor.u32 1.1754944e-38, %v547_v40 }
 0x1d1   :  { %v514_v28 = vsel %vm513_vm5, %v1289_v49, %v510_v16  ;;  %v538_v33 = vsub.f32 1.0, %v537_v29  ;;  %v552_v45 = vmul.f32 %v1295_v34, %v1644_v63  ;;  %v562_v53 = vand.u32 2147483648, %v1644_v63 }
 0x1d2   :  { %v519_v30 = vsel %vm1652_vm1, %v518_v21, %v514_v28  ;;  %v529_v32 = vsel %vm528_vm9, %v1291_v60, %v525_v22  ;;  %vm557_vm1 = vweird.f32 %v1295_v34  ;;  %v560_v57 = vand.u32 2147483647, %v1644_v63 }
 0x1d3   :  { %v570_v31 = vmul.f32 %v519_v30, %v1547_v42  ;;  %v534_v37 = vsel %vm531_vm10, %v533_v25, %v529_v32  ;;  %v539_v44 = vmul.f32 %v1293_v18, %v538_v33  ;;  %v553_v48 = vsub.f32 1.0, %v552_v45 }
 0x1d4   :  { %v571_v41 = vmul.f32 %v534_v37, %v1549_v43  ;;  %vm501_vm2 = vcmp.eq.f32.partialorder %v500_v58, 8.507059e+37  ;;  %v503_v59 = vor.u32 1.1754944e-38, %v502_v27  ;;  %v568_v61 = vmul.f32 %v489_v46, %v1543_v38 }
 0x1d5   :  { %v574_v42 = vpack.c.bf16 %v570_v31, %v566_v19  ;;  %v540_v43 = vadd.f32 %v1293_v18, %v539_v44  ;;  %v554_v56 = vmul.f32 %v1295_v34, %v553_v48  ;;  %vm556_vm3 = vweird.f32 %v1644_v63 }
 0x1d6   :  { %v575_v49 = vpack.c.bf16 %v571_v41, %v567_v24  ;;  %v504_v0 = vsel %vm501_vm2, %v503_v59, %v499_v50  ;;  %vm558_vm4 = vmor %vm556_vm3, %vm557_vm1  ;;  %v563_v1 = vor.u32 1.1754944e-38, %v562_v53  ;;  %vm561_vm5 = vcmp.eq.f32.partialorder %v560_v57, 8.507059e+37 }
 0x1d7   :  { %846 = vmatmul.bf16.vlgmr.msrb.gmra.mxu0 %v574_v42  ;;  %v544_v55 = vsel %vm543_vm15, %v1293_v18, %v540_v43  ;;  %v555_v52 = vadd.f32 %v1295_v34, %v554_v56  ;;  %v569_v7 = vmul.f32 %v504_v0, %v1545_v39 }
 0x1d8   :  { %860 = vmatmul.bf16.vlgmr.msrb.gmra.mxu1 %v575_v49  ;;  %v549_v60 = vsel %vm546_vm0, %v548_v51, %v544_v55 }
 0x1d9   :  { %v572_v35 = vmul.f32 %v549_v60, %v1561_v62  ;;  %v559_v3 = vsel %vm558_vm4, %v1295_v34, %v555_v52  ;;  %v1259_v62 = vld [vmem:[%s1731_s6] ss:$0 sm:$0xff]  ;;  %s902_s6 = sshll.u32 %s1732_s7, 4  ;;  %s903_s6 = int_to_ptr.hbm [resolvable:$true] %s902_s6 }
 0x1da   :  { %v564_v54 = vsel %vm561_vm5, %v563_v1, %v559_v3 }
 0x1db   :  { %v576_v6 = vpack.c.bf16 %v572_v35, %v568_v61  ;;  %v573_v4 = vmul.f32 %v564_v54, %v1563_v2 }
 0x1dd   :  { %874 = vmatmul.bf16.vlgmr.msrb.gmra.mxu2 %v576_v6  ;;  %v577_v58 = vpack.c.bf16 %v573_v4, %v569_v7 }
 0x1df   :  { %888 = vmatmul.bf16.vlgmr.msrb.gmra.mxu3 %v577_v58 }
 0x254   :  { %v847_v38 = vpop.f32.mrf.mxu0 }
 0x255   :  { %v848_v63 = vadd.f32 %v1259_v62, %v847_v38  ;;  %v861_v9 = vpop.f32.mrf.mxu1 }
 0x257   :  { %v862_v10 = vadd.f32 %v861_v9, %v848_v63 }
 0x25c   :  { %v849_v12 = vpop.f32.mrf.mxu0 }
 0x25d   :  { %v850_v13 = vadd.f32 %v1259_v62, %v849_v12  ;;  %v863_v39 = vpop.f32.mrf.mxu1 }
 0x25f   :  { %v864_v16 = vadd.f32 %v863_v39, %v850_v13 }
 0x260   :  { %v875_v11 = vpop.f32.mrf.mxu2 }
 0x261   :  { %v876_v8 = vadd.f32 %v875_v11, %v862_v10 }
 0x262   :  { %v889_v14 = vpop.f32.mrf.mxu3 }
 0x263   :  { %v890_v15 = vadd.f32 %v889_v14, %v876_v8 }
 0x265   :  { %894 = vst [vmem:[#allocation11] sm:$0xff] %v890_v15 }
 0x268   :  { %v877_v2 = vpop.f32.mrf.mxu2 }
 0x269   :  { %v878_v17 = vadd.f32 %v877_v2, %v864_v16 }
 0x26a   :  { %v891_v18 = vpop.f32.mrf.mxu3 }
 0x26b   :  { %v892_v19 = vadd.f32 %v891_v18, %v878_v17 }
 0x26d   :  { %895 = vst [vmem:[#allocation11 + $0x8] sm:$0xff] %v892_v19 }
 0x26e   :  { %908 = dma.vmem_to_hbm [thread:$0]  %s901_s8, 256, %s903_s6, [#allocation4], %s1451_s18, %s1451_s18, %s1452_s4  }
 0x26f   :  { %1446 = dma.done.wait [#allocation4], 256  }
 0x270   :  { %1447 = vsyncadd [#allocation4], 4294967040 }
 0x271   :  { %913 = vsyncpa [#allocation3], 1 }
 0x272   :  { %914 = vsyncpa [#allocation6], 1 }
 0x273   :  { %915 = vsyncpa [#allocation9], 1 }
 0x274   :  { %916 = vsyncpa [#allocation4], 1 }

</bundles_post_ra>
